<compile_context>
chip_gen: v6e
topology: v6e:2x2x1
jax: 0.10.0
libtpu: 0.0.40
codegen_flags: <defaults>
</compile_context>

<pallas_src>
import math
import functools

import jax
import jax.numpy as jnp
from jax import lax
from jax.experimental import pallas as pl
from jax.experimental.pallas import tpu as pltpu


_INV_SQRT2 = 1.0 / math.sqrt(2.0)


def _gelu_exact(h):
    # torch.nn.functional.gelu default (erf form).
    return 0.5 * h * (1.0 + lax.erf(h * _INV_SQRT2))


def _ffn_kernel_inplace(x_ref, w1_ref, b1_ref, w2_ref, b2_ref, o_ref):
    """f32-output variant: accumulate partial sums directly into o_ref."""
    kf = pl.program_id(1)

    @pl.when(kf == 0)
    def _():
        o_ref[...] = jnp.broadcast_to(b2_ref[...], o_ref.shape).astype(o_ref.dtype)

    h = jnp.dot(x_ref[...], w1_ref[...], preferred_element_type=jnp.float32)
    h = _gelu_exact(h + b1_ref[...])
    o_ref[...] += jnp.dot(h.astype(w2_ref.dtype), w2_ref[...],
                          preferred_element_type=jnp.float32)


def _ffn_kernel_acc(x_ref, w1_ref, b1_ref, w2_ref, b2_ref, o_ref, acc_ref):
    """Generic variant: f32 VMEM accumulator, cast to output dtype at the end."""
    kf = pl.program_id(1)

    @pl.when(kf == 0)
    def _():
        acc_ref[...] = jnp.zeros_like(acc_ref)

    h = jnp.dot(x_ref[...], w1_ref[...], preferred_element_type=jnp.float32)
    h = _gelu_exact(h + b1_ref[...])
    acc_ref[...] += jnp.dot(h.astype(w2_ref.dtype), w2_ref[...],
                            preferred_element_type=jnp.float32)

    @pl.when(kf == pl.num_programs(1) - 1)
    def _():
        o_ref[...] = (acc_ref[...] + b2_ref[...]).astype(o_ref.dtype)


def _cdiv(a, b):
    return -(-a // b)


def _round_up(x, m):
    return _cdiv(x, m) * m


def _vmem_capacity_bytes():
    try:
        return int(pltpu.get_tpu_info().vmem_capacity_bytes)
    except Exception:
        return 64 << 20  # conservative: v7x per-TensorCore VMEM


def _choose_tf(F, desired):
    """F tile: a multiple of 128 (preferring 256 multiples) dividing F if one
    exists; otherwise a 128-aligned tile (F is then zero-padded up to it)."""
    desired = max(128, min(_round_up(desired, 128), _round_up(F, 128)))
    for align in (256, 128):
        cand = (desired // align) * align
        while cand >= align:
            if F % cand == 0:
                return cand
            cand -= align
    return desired  # no aligned divisor: caller pads F up to a multiple of tf


def _estimate_vmem(tm, tf, H, isz_x, isz_w, isz_o, needs_acc):
    return (2 * tm * H * isz_x             # x tile (double buffered)
            + 2 * H * tf * isz_w           # W1 tile
            + 2 * tf * isz_w               # b1 tile
            + 2 * tf * H * isz_w           # W2 tile
            + 2 * H * isz_w                # b2
            + 2 * tm * H * isz_o           # output tile
            + (tm * H * 4 if needs_acc else 0)   # f32 accumulator scratch
            + tm * tf * (4 + isz_w))       # GELU intermediate + cast copy


@functools.partial(jax.jit, static_argnames=("tm_desired", "tf_desired"))
def feed_forward(x, w1, b1, w2, b2, *, tm_desired=None, tf_desired=512):
    """GPT MLP: gelu(x @ w1 + b1) @ w2 + b2 for x of shape [batch, seq, hidden]."""
    batch, seq, hidden = x.shape
    F = w1.shape[1]
    M = batch * seq
    x2d = x.reshape(M, hidden)

    isz_x = jnp.dtype(x.dtype).itemsize
    isz_w = jnp.dtype(w1.dtype).itemsize
    out_dtype = x.dtype
    isz_o = jnp.dtype(out_dtype).itemsize
    needs_acc = out_dtype != jnp.float32

    # ---- device-aware tile budget -----------------------------------------
    cap = _vmem_capacity_bytes()
    big_vmem = cap >= (96 << 20)          # v5e / v6e (128 MiB); v7x is 64 MiB
    # Sub-32-bit dtypes pack along sublanes: bf16 rows align to 16, int8 to 32.
    row_align = {4: 8, 2: 16, 1: 32}.get(isz_x, 8)

    if tm_desired is None:
        if isz_x <= 2:
            tm_base = 1024 if big_vmem else 512
        else:
            tm_base = 512 if big_vmem else 256
    else:
        tm_base = max(row_align, tm_desired)

    # Row tile: as large as possible (amortizes W1/W2 streaming per M tile).
    # tm < M must be row_align-aligned; tm == M (full dim) is always legal.
    tm = min(tm_base, M)
    if tm < M:
        tm = max(row_align, (tm // row_align) * row_align)

    # F tile for the (last, "arbitrary") reduction axis.
    tf = _choose_tf(F, tf_desired)

    # Keep >= 2 M tiles so the "parallel" axis can shard across both v7x cores.
    if _cdiv(M, tm) < 2 and tm >= 2 * row_align:
        tm = _round_up(tm // 2, row_align)

    # Fit the double-buffered working set into scoped VMEM (with headroom).
    budget = int(cap * 0.9) - (6 << 20)
    while _estimate_vmem(tm, tf, hidden, isz_x, isz_w, isz_o, needs_acc) > budget:
        if tf > 256:
            tf = max(256, ((tf // 2) // 128) * 128)
        elif tm > 2 * row_align:
            tm = max(row_align, _round_up(tm // 2, row_align))
        elif tf > 128:
            tf = 128
        elif tm > row_align:
            tm = max(row_align, _round_up(tm // 2, row_align))
        else:
            break

    # Zero-pad the F axis so tf always tiles it. GELU(0 + 0) = 0 and the
    # corresponding zero rows of W2 contribute nothing, so padding is exact.
    F_pad = _round_up(F, tf)
    if F_pad != F:
        w1 = jnp.pad(w1, ((0, 0), (0, F_pad - F)))
        b1 = jnp.pad(b1, ((0, F_pad - F),))
        w2 = jnp.pad(w2, ((0, F_pad - F), (0, 0)))
    num_f = F_pad // tf
    num_m = _cdiv(M, tm)   # no explicit M padding: Pallas masks the edge block

    b1_2d = b1.reshape(1, F_pad)
    b2_2d = b2.reshape(1, hidden)

    est = _estimate_vmem(tm, tf, hidden, isz_x, isz_w, isz_o, needs_acc)
    vmem_limit = int(min(cap - (2 << 20), max(32 << 20, est * 1.2 + (2 << 20))))

    if needs_acc:
        kernel = _ffn_kernel_acc
        scratch = [pltpu.VMEM((tm, hidden), jnp.float32)]
    else:
        kernel = _ffn_kernel_inplace
        scratch = []

    out2d = pl.pallas_call(
        kernel,
        out_shape=jax.ShapeDtypeStruct((M, hidden), out_dtype),
        grid_spec=pltpu.PrefetchScalarGridSpec(
            num_scalar_prefetch=0,
            grid=(num_m, num_f),
            in_specs=[
                pl.BlockSpec((tm, hidden), lambda i, kf: (i, 0)),    # x tile
                pl.BlockSpec((hidden, tf), lambda i, kf: (0, kf)),   # W1 slice
                pl.BlockSpec((1, tf), lambda i, kf: (0, kf)),        # b1 slice
                pl.BlockSpec((tf, hidden), lambda i, kf: (kf, 0)),   # W2 slice
                pl.BlockSpec((1, hidden), lambda i, kf: (0, 0)),     # b2
            ],
            out_specs=pl.BlockSpec((tm, hidden), lambda i, kf: (i, 0)),
            scratch_shapes=scratch,
        ),
        compiler_params=pltpu.CompilerParams(
            dimension_semantics=("parallel", "arbitrary"),
            vmem_limit_bytes=vmem_limit),
    )(x2d, w1, b1_2d, w2, b2_2d)

    return out2d.reshape(batch, seq, hidden)


def _reference(x, w1, b1, w2, b2):
    f32 = jnp.float32
    hp = lax.Precision.HIGHEST
    h = jnp.einsum("bsh,hf->bsf", x.astype(f32), w1.astype(f32), precision=hp)
    h = h + b1.astype(f32)
    h = 0.5 * h * (1.0 + lax.erf(h * _INV_SQRT2))
    h = h.astype(w2.dtype).astype(f32)   # kernel casts the GELU output to the weight dtype
    return jnp.einsum("bsf,fh->bsh", h, w2.astype(f32), precision=hp) + b2.astype(f32)


def _make_params(key, hidden, ffn_hidden, dtype=jnp.float32):
    kw1, kb1, kw2, kb2 = jax.random.split(key, 4)
    w1 = (jax.random.normal(kw1, (hidden, ffn_hidden), jnp.float32)
          * (1.0 / math.sqrt(hidden))).astype(dtype)
    b1 = (jax.random.normal(kb1, (ffn_hidden,), jnp.float32) * 0.01).astype(dtype)
    w2 = (jax.random.normal(kw2, (ffn_hidden, hidden), jnp.float32)
          * (1.0 / math.sqrt(ffn_hidden))).astype(dtype)
    b2 = (jax.random.normal(kb2, (hidden,), jnp.float32) * 0.01).astype(dtype)
    return w1, b1, w2, b2


if __name__ == "__main__":
    key = jax.random.PRNGKey(0)

    # --- Case 1: module-consistent small shapes (f32, in-place accumulation) ---
    batch, seq, hidden, ratio = 2, 8, 32, 4
    ffn_hidden = hidden * ratio
    kx, kp = jax.random.split(key)
    x = jax.random.normal(kx, (batch, seq, hidden), dtype=jnp.float32)
    w1, b1, w2, b2 = _make_params(kp, hidden, ffn_hidden)

    out = jax.block_until_ready(feed_forward(x, w1, b1, w2, b2))
    ref = _reference(x, w1, b1, w2, b2)
    assert out.shape == (batch, seq, hidden)
    assert jnp.allclose(out, ref, atol=2e-3, rtol=2e-3), "mismatch vs reference (case 1)"

    # --- Case 2: F-axis accumulation + non-divisible M (masked edge block) ---
    batch2, seq2, hidden2, ratio2 = 2, 20, 128, 4
    ffn_hidden2 = hidden2 * ratio2
    kx2, kp2 = jax.random.split(jax.random.fold_in(key, 1))
    x2 = jax.random.normal(kx2, (batch2, seq2, hidden2), dtype=jnp.float32)
    w1b, b1b, w2b, b2b = _make_params(kp2, hidden2, ffn_hidden2)

    out2 = jax.block_until_ready(
        feed_forward(x2, w1b, b1b, w2b, b2b, tm_desired=16, tf_desired=128))
    ref2 = _reference(x2, w1b, b1b, w2b, b2b)
    assert out2.shape == (batch2, seq2, hidden2)
    assert jnp.allclose(out2, ref2, atol=2e-3, rtol=2e-3), "mismatch vs reference (case 2)"

    # --- Case 3: bf16 path (bf16 MXU matmuls, f32 accumulator scratch) ---
    batch3, seq3, hidden3, ratio3 = 2, 24, 256, 4
    ffn_hidden3 = hidden3 * ratio3
    kx3, kp3 = jax.random.split(jax.random.fold_in(key, 2))
    x3 = jax.random.normal(kx3, (batch3, seq3, hidden3), dtype=jnp.float32).astype(jnp.bfloat16)
    w1c, b1c, w2c, b2c = _make_params(kp3, hidden3, ffn_hidden3, dtype=jnp.bfloat16)

    out3 = jax.block_until_ready(feed_forward(x3, w1c, b1c, w2c, b2c))
    ref3 = _reference(x3, w1c, b1c, w2c, b2c)
    assert out3.shape == (batch3, seq3, hidden3)
    assert out3.dtype == jnp.bfloat16
    assert jnp.allclose(out3.astype(jnp.float32), ref3, atol=2e-2, rtol=2e-2), \
        "mismatch vs reference (case 3)"

    print("KERNEL_OK")
</pallas_src>

<mosaic_0001>
module attributes {stable_mosaic.version = 11 : i64} {
  func.func @_ffn_kernel_inplace(%arg0: i32, %arg1: i32, %arg2: memref<8x32xf32, #tpu.memory_space<vmem>>, %arg3: memref<32x128xf32, #tpu.memory_space<vmem>>, %arg4: memref<1x128xf32, #tpu.memory_space<vmem>>, %arg5: memref<128x32xf32, #tpu.memory_space<vmem>>, %arg6: memref<1x32xf32, #tpu.memory_space<vmem>>, %arg7: memref<8x32xf32, #tpu.memory_space<vmem>>) attributes {dimension_semantics = [#tpu.dimension_semantics<parallel>, #tpu.dimension_semantics<arbitrary>], iteration_bounds = array<i64: 2, 1>, scalar_prefetch = 0 : i64, scratch_operands = 0 : i64, tpu.core_type = #tpu.core_type<tc>, window_params = [{transform_indices = @transform_0, window_bounds = array<i64: 8, 32>}, {transform_indices = @transform_1, window_bounds = array<i64: 32, 128>}, {transform_indices = @transform_2, window_bounds = array<i64: 1, 128>}, {transform_indices = @transform_3, window_bounds = array<i64: 128, 32>}, {pipeline_mode = #tpu.pipeline_mode<synchronous>, transform_indices = @transform_4, window_bounds = array<i64: 1, 32>}, {transform_indices = @transform_5, window_bounds = array<i64: 8, 32>}]} {
    %c0_i32 = arith.constant 0 : i32
    %0 = arith.cmpi eq, %arg1, %c0_i32 : i32
    %1 = arith.extui %0 : i1 to i32
    %c0_i32_0 = arith.constant 0 : i32
    %2 = arith.cmpi ne, %1, %c0_i32_0 : i32
    scf.if %2 {
      %c0_16 = arith.constant 0 : index
      %c0_17 = arith.constant 0 : index
      %22 = vector.load %arg6[%c0_16, %c0_17] : memref<1x32xf32, #tpu.memory_space<vmem>>, vector<1x32xf32>
      %23 = vector.shape_cast %22 : vector<1x32xf32> to vector<1x32xf32>
      %24 = vector.broadcast %23 : vector<1x32xf32> to vector<8x32xf32>
      %c0_18 = arith.constant 0 : index
      %c0_19 = arith.constant 0 : index
      %25 = vector.load %arg7[%c0_18, %c0_19] : memref<8x32xf32, #tpu.memory_space<vmem>>, vector<8x32xf32>
      tpu.vector_store %arg7[%c0_18, %c0_19], %24 {strides = array<i32>} : memref<8x32xf32, #tpu.memory_space<vmem>>, vector<8x32xf32>,
    } else {
    }
    %c0 = arith.constant 0 : index
    %c0_1 = arith.constant 0 : index
    %3 = vector.load %arg2[%c0, %c0_1] : memref<8x32xf32, #tpu.memory_space<vmem>>, vector<8x32xf32>
    %c0_2 = arith.constant 0 : index
    %c0_3 = arith.constant 0 : index
    %4 = vector.load %arg3[%c0_2, %c0_3] : memref<32x128xf32, #tpu.memory_space<vmem>>, vector<32x128xf32>
    %cst = arith.constant dense<0.000000e+00> : vector<8x128xf32>
    %5 = tpu.matmul %3, %4, %cst {dimension_numbers = #tpu.dot_dimension_numbers<[1], [0], [0], [1], [0, 0, 1, 1], [], []>} : vector<8x32xf32>, vector<32x128xf32>, vector<8x128xf32> -> vector<8x128xf32>
    %c0_4 = arith.constant 0 : index
    %c0_5 = arith.constant 0 : index
    %6 = vector.load %arg4[%c0_4, %c0_5] : memref<1x128xf32, #tpu.memory_space<vmem>>, vector<1x128xf32>
    %7 = vector.broadcast %6 : vector<1x128xf32> to vector<8x128xf32>
    %8 = arith.addf %5, %7 : vector<8x128xf32>
    %cst_6 = arith.constant 5.000000e-01 : f32
    %9 = vector.broadcast %cst_6 : f32 to vector<8x128xf32>
    %10 = arith.mulf %9, %8 : vector<8x128xf32>
    %cst_7 = arith.constant 0.707106769 : f32
    %11 = vector.broadcast %cst_7 : f32 to vector<8x128xf32>
    %12 = arith.mulf %8, %11 : vector<8x128xf32>
    %13 = math.erf %12 : vector<8x128xf32>
    %cst_8 = arith.constant 1.000000e+00 : f32
    %14 = vector.broadcast %cst_8 : f32 to vector<8x128xf32>
    %15 = arith.addf %14, %13 : vector<8x128xf32>
    %16 = arith.mulf %10, %15 : vector<8x128xf32>
    %c0_9 = arith.constant 0 : index
    %c0_10 = arith.constant 0 : index
    %17 = vector.load %arg7[%c0_9, %c0_10] : memref<8x32xf32, #tpu.memory_space<vmem>>, vector<8x32xf32>
    %c0_11 = arith.constant 0 : index
    %c0_12 = arith.constant 0 : index
    %18 = vector.load %arg5[%c0_11, %c0_12] : memref<128x32xf32, #tpu.memory_space<vmem>>, vector<128x32xf32>
    %cst_13 = arith.constant dense<0.000000e+00> : vector<8x32xf32>
    %19 = tpu.matmul %16, %18, %cst_13 {dimension_numbers = #tpu.dot_dimension_numbers<[1], [0], [0], [1], [0, 0, 1, 1], [], []>} : vector<8x128xf32>, vector<128x32xf32>, vector<8x32xf32> -> vector<8x32xf32>
    %20 = arith.addf %17, %19 : vector<8x32xf32>
    %c0_14 = arith.constant 0 : index
    %c0_15 = arith.constant 0 : index
    %21 = vector.load %arg7[%c0_14, %c0_15] : memref<8x32xf32, #tpu.memory_space<vmem>>, vector<8x32xf32>
    tpu.vector_store %arg7[%c0_14, %c0_15], %20 {strides = array<i32>} : memref<8x32xf32, #tpu.memory_space<vmem>>, vector<8x32xf32>,
    return
  }
  func.func @transform_0(%arg0: i32, %arg1: i32) -> (i32, i32) {
    %c0_i32 = arith.constant 0 : i32
    %c0_i32_0 = arith.constant 0 : i32
    return %arg0, %c0_i32 : i32, i32
  }
  func.func @transform_1(%arg0: i32, %arg1: i32) -> (i32, i32) {
    %c0_i32 = arith.constant 0 : i32
    %c0_i32_0 = arith.constant 0 : i32
    return %c0_i32, %arg1 : i32, i32
  }
  func.func @transform_2(%arg0: i32, %arg1: i32) -> (i32, i32) {
    %c0_i32 = arith.constant 0 : i32
    %c0_i32_0 = arith.constant 0 : i32
    return %c0_i32, %arg1 : i32, i32
  }
  func.func @transform_3(%arg0: i32, %arg1: i32) -> (i32, i32) {
    %c0_i32 = arith.constant 0 : i32
    %c0_i32_0 = arith.constant 0 : i32
    return %arg1, %c0_i32 : i32, i32
  }
  func.func @transform_4(%arg0: i32, %arg1: i32) -> (i32, i32) {
    %c0_i32 = arith.constant 0 : i32
    %c0_i32_0 = arith.constant 0 : i32
    %c0_i32_1 = arith.constant 0 : i32
    return %c0_i32, %c0_i32_0 : i32, i32
  }
  func.func @transform_5(%arg0: i32, %arg1: i32) -> (i32, i32) {
    %c0_i32 = arith.constant 0 : i32
    %c0_i32_0 = arith.constant 0 : i32
    return %arg0, %c0_i32 : i32, i32
  }
}

</mosaic_0001>

<bundles_post_ra>
// kernel: feed_forward.1
= control target key start
LH: loop header
LB: loop body
LE: loop exit
PB: predicated region body
PF: predicated region fallthrough
CT: control target
= control target key end

     0   :  { %10 = vsyncpa [#allocation3], 0  ;;  %s1054_s0 = inlined_call_operand.vmem [shape: f32[16,32], index: 0, kind: input, shape index: {}]   ;;  %s1055_s1 = inlined_call_operand.vmem [shape: f32[32,128], index: 1, kind: input, shape index: {}]   ;;  %s1056_s2 = inlined_call_operand.vmem [shape: f32[1,128], index: 2, kind: input, shape index: {}]   ;;  %s1057_s3 = inlined_call_operand.vmem [shape: f32[128,32], index: 3, kind: input, shape index: {}]   ;;  %s1058_s4 = inlined_call_operand.vmem [shape: f32[1,32], index: 4, kind: input, shape index: {}]   ;;  %s1059_s5 = inlined_call_operand.hbm [shape: f32[16,32], index: 5, kind: output, shape index: {}]  }
   0x1   :  { %12 = vsyncpa [#allocation3 + $0x1], 0  ;;  %s856_s18 = smov 0   ;;  %s858_s19 = smov 0  }
   0x2   :  { %s860_s20 = smov 0   ;;  %s862_s21 = smov 0  }
   0x3   :  { %s864_s22 = smov 0   ;;  %s866_s23 = smov 0  }
   0x4 LB: > { %s601_s24 = sadd.s32 4294967295, %s821_s23   ;;  %s602_s25 = sadd.s32 4294967294, %s821_s23   ;;  %s821_s23 = sphi %s866_s23, %s18_s23   ;;  %s817_s22 = sphi %s864_s22, %s1066_s22   ;;  %s813_s21 = sphi %s862_s21, %s1065_s21   ;;  %s809_s20 = sphi %s860_s20, %s1064_s20   ;;  %s805_s19 = sphi %s858_s19, %s1063_s19   ;;  %s801_s18 = sphi %s856_s18, %s1062_s18  }
   0x5   : > { %s30_s26 = sadd.s32 1, %s817_s22  ;;  %s162_s27 = sadd.s32 1, %s809_s20 }
   0x6   : > { %p32_p0 = scmp.ge.s32.totalorder %s30_s26, 2  ;;  %p172_p1 = scmp.ne.s32.totalorder %s809_s20, %s805_s19 }
   0x7   : > { %p173_p2 = scmp.eq.s32.totalorder %s601_s24, 1  ;;  %p178_p3 = scmp.ne.s32.totalorder %s805_s19, %s801_s18 }
   0x8   : > { %s1068_s26 = smov (%p32_p0, %s30_s26), 0  ;;  %p179_p5 = scmp.eq.s32.totalorder %s602_s25, 1 }
   0x9   : > { %p896_p4 = por %p173_p2, %p172_p1  ;;  %s159_s29 = ssub.s32 %s817_s22, %s1068_s26 }
   0xa   : > { %p608_p6 = scmp.ge.s32.totalorder %s821_s23, 1  ;;  %p160_p7 = scmp.eq.s32.totalorder %s159_s29, 0 }
   0xb   : > { %p903_p8 = por %p179_p5, %p178_p3  ;;  %p229_p9 = scmp.lt.s32.totalorder %s821_s23, 3 }
   0xc   : > { %s909_s6 = scalar_select %p160_p7, %s809_s20, %s162_s27  }
   0xd   : > { %p230_p10 = pnand %p608_p6, %p229_p9 }
   0xe   : > { %p268_p11 = scmp.lt.s32.totalorder (!%p230_p10), %s813_s21, 1  ;;  %s265_s7 = sand.u32 (!%p230_p10), 1, %s805_s19  }
   0xf   : > { %233 = sbr.rel (%p230_p10) target bundleno = 452 (0x1c4), region = 40  ;;  %s615_s14 = sshll.u32 (!%p230_p10), %s813_s21, 7 }
  0x10   : > { %s479_s25 = scalar_lea.sflag (!%p230_p10), [#allocation3], %s265_s7  ;;  %s825_s29 = smov (!%p230_p10), [#allocation2]  }
  0x14   : > { %v302_v0 = vld [vmem:[%s1055_s1 + $0x18] sm:$0xff]  ;;  %v823_v1 = vmov 0.0   ;;  %v301_v2 = vld [vmem:[%s1055_s1 + $0x10] sm:$0xff]  ;;  %vm824_vm0 = vmmov 0   ;;  %s269_s13 = scalar_select %p268_p11, %s813_s21, 1  ;;  %v300_v5 = vld [vmem:[%s1055_s1 + $0x8] sm:$0xff] }
  0x15   : > { %640 = vmatprep.subr.mxu0 %v823_v1  ;;  %648 = vmatprep.mubr.msk.f32.mxu0 %vm824_vm0, %v823_v1  ;;  %v405_v3 = vld [vmem:[%s1057_s3 + $0x78] sm:$0xff]  ;;  %v404_v4 = vld [vmem:[%s1057_s3 + $0x70] sm:$0xff]  ;;  %v403_v6 = vld [vmem:[%s1057_s3 + $0x68] sm:$0xff]  ;;  %vm296_vm1 = vcmask 261120   ;;  %s749_s21 = sshll.u32 %s825_s29, 4  ;;  %s750_s21 = int_to_ptr.vmem [resolvable:$false] %s749_s21 }
  0x16   : > { %641 = vmatpush3.msra.mxu0 %v302_v0  ;;  %651 = vmatprep.subr.mxu1 %v823_v1  ;;  %s610_s24 = sshll.u32 %s269_s13, 3  ;;  %v299_v7 = vld [vmem:[%s1055_s1] sm:$0xff]  ;;  %v401_v10 = vld [vmem:[%s1057_s3 + $0x58] sm:$0xff]  ;;  %v400_v11 = vld [vmem:[%s1057_s3 + $0x50] sm:$0xff]  ;;  %s751_s8 = scalar_lea.vmem %s750_s21, 256 }
  0x17   : > { %642 = vmatprep.subr.mxu0 %v823_v1  ;;  %652 = vmatpush3.msra.mxu1 %v405_v3  ;;  %s271_s10 = scalar_lea.vmem %s1054_s0, %s610_s24  ;;  %v402_v9 = vld [vmem:[%s1057_s3 + $0x60] sm:$0xff]  ;;  %v399_v12 = vld [vmem:[%s1057_s3 + $0x48] sm:$0xff]  ;;  %v397_v14 = vld [vmem:[%s1057_s3 + $0x38] sm:$0xff]  ;;  %s1013_s24 = scalar_lea.hbm %s1059_s5, %s615_s14 }
  0x18   : > { %643 = vmatpush3.msra.mxu0 %v301_v2  ;;  %653 = vmatprep.subr.mxu1 %v823_v1  ;;  %v298_v8 = vld [vmem:[%s271_s10] sm:$0xff]  ;;  %v396_v15 = vld [vmem:[%s1057_s3 + $0x30] sm:$0xff]  ;;  %v395_v16 = vld [vmem:[%s1057_s3 + $0x28] sm:$0xff]  ;;  %s609_s10 = sshll.u32 %s265_s7, 3 }
  0x19   : > { %644 = vmatprep.subr.mxu0 %v823_v1  ;;  %654 = vmatpush3.msra.mxu1 %v404_v4  ;;  %v398_v13 = vld [vmem:[%s1057_s3 + $0x40] sm:$0xff]  ;;  %v393_v18 = vld [vmem:[%s1057_s3 + $0x18] sm:$0xff]  ;;  %v392_v19 = vld [vmem:[%s1057_s3 + $0x10] sm:$0xff]  ;;  %s267_s11 = scalar_lea.vmem [#allocation2], %s609_s10 }
  0x1a   : > { %645 = vmatpush3.msra.mxu0 %v300_v5  ;;  %655 = vmatprep.subr.mxu1 %v823_v1  ;;  %v394_v17 = vld [vmem:[%s1057_s3 + $0x20] sm:$0xff]  ;;  %v391_v20 = vld [vmem:[%s1057_s3 + $0x8] sm:$0xff]  ;;  %s492_s15 = sshll.u32 %s267_s11, 4  ;;  %s493_s15 = int_to_ptr.vmem [resolvable:$true] %s492_s15 }
  0x1b   : > { %646 = vmatprep.subr.mxu0 %v823_v1  ;;  %656 = vmatpush3.msra.mxu1 %v403_v6  ;;  %v390_v21 = vld [vmem:[%s1057_s3] sm:$0xff]  ;;  %s745_s27 = scalar_lea.vmem %s493_s15, 128  ;;  %p752_p1 = scmp.lt.s32.totalorder %s493_s15, %s750_s21 }
  0x1c   : > { %647 = vmatpush3.msra.mxu0 %v299_v7  ;;  %657 = vmatprep.subr.mxu1 %v823_v1  ;;  %v611_v22 = vld [vmem:[%s1058_s4] ss:$0 sm:$0xff]  ;;  %p746_p12 = scmp.ne.s32.totalorder %s493_s15, %s745_s27  ;;  %p753_p2 = scmp.lt.s32.totalorder %s751_s8, %s745_s27 }
  0x1d   : > { %649 = vmatmul.mubr.msk.f32.vlgmr.msra.gmra.mxu0 %vm296_vm1, %v298_v8  ;;  %658 = vmatpush3.msra.mxu1 %v402_v9  ;;  %297 = vst.msk [vmem:[%s267_s11] sm:$0xff] %vm296_vm1, %v611_v22  ;;  %v612_v23 = vld [vmem:[%s1056_s2] ss:$0 sm:$0xff] }
  0x1e   : > { %659 = vmatprep.subr.mxu1 %v823_v1  ;;  %683 = vmatprep.mubr.msk.f32.mxu1 %vm824_vm0, %v823_v1  ;;  %p747_p13 = pnand %p746_p12, %p896_p4  ;;  %p754_p3 = por %p753_p2, %p752_p1 }
  0x1f   : > { %660 = vmatpush3.msra.mxu1 %v401_v10 }
  0x20   : > { %661 = vmatprep.subr.mxu1 %v823_v1  ;;  %p748_p0 = pneg %p747_p13 }
  0x21   : > { %662 = vmatpush3.msra.mxu1 %v400_v11 }
  0x22   : > { %663 = vmatprep.subr.mxu1 %v823_v1  ;;  %p755_p5 = pnand %p754_p3, %p748_p0 }
  0x23   : > { %664 = vmatpush3.msra.mxu1 %v399_v12 }
  0x24   : > { %665 = vmatprep.subr.mxu1 %v823_v1  ;;  %v389_v32 = vld [vmem:[%s267_s11] sm:$0xff] }
  0x25   : > { %666 = vmatpush3.msra.mxu1 %v398_v13 }
  0x26   : > { %667 = vmatprep.subr.mxu1 %v823_v1 }
  0x27   : > { %668 = vmatpush3.msra.mxu1 %v397_v14 }
  0x28   : > { %669 = vmatprep.subr.mxu1 %v823_v1 }
  0x29   : > { %670 = vmatpush3.msra.mxu1 %v396_v15 }
  0x2a   : > { %671 = vmatprep.subr.mxu1 %v823_v1 }
  0x2b   : > { %672 = vmatpush3.msra.mxu1 %v395_v16 }
  0x2c   : > { %673 = vmatprep.subr.mxu1 %v823_v1 }
  0x2d   : > { %674 = vmatpush3.msra.mxu1 %v394_v17 }
  0x2e   : > { %675 = vmatprep.subr.mxu1 %v823_v1 }
  0x2f   : > { %676 = vmatpush3.msra.mxu1 %v393_v18 }
  0x30   : > { %677 = vmatprep.subr.mxu1 %v823_v1 }
  0x31   : > { %678 = vmatpush3.msra.mxu1 %v392_v19 }
  0x32   : > { %679 = vmatprep.subr.mxu1 %v823_v1 }
  0x33   : > { %680 = vmatpush3.msra.mxu1 %v391_v20 }
  0x34   : > { %681 = vmatprep.subr.mxu1 %v823_v1 }
  0x35   : > { %682 = vmatpush3.msra.mxu1 %v390_v21 }
  0xdd   : > { %v380_v24 = vpop.f32.mrf.mxu0 }
  0xde   : > { %v381_v25 = vadd.f32 %v612_v23, %v380_v24 }
  0xdf   : > { %v650_v26 = vpop.f32.mrf.mxu0 }
  0xe0   : > { %v385_v27 = vmul.f32 0.70710677, %v381_v25  ;;  %v384_v29 = vmul.f32 0.5, %v381_v25 }
  0xe2   : > { %743 = verf.f32 %v385_v27 }
  0xef   : > { %v744_v28 = vpop.eup %743 }
  0xf0   : > { %v387_v30 = vadd.f32 1.0, %v744_v28 }
  0xf2   : > { %v388_v31 = vmul.f32 %v387_v30, %v384_v29 }
  0xf4   : > { %684 = vmatmul.mubr.f32.vlgmr.msra.gmra.mxu1 %v388_v31 }
 0x1b4   : > { %v472_v33 = vpop.f32.mrf.mxu1 }
 0x1b5   : > { %v476_v34 = vadd.f32 %v472_v33, %v389_v32 }
 0x1b6   : > { %v685_v35 = vpop.f32.mrf.mxu1 }
 0x1b7   : > { %477 = vst.msk [vmem:[%s267_s11] sm:$0xff] %vm296_vm1, %v476_v34 }
 0x1b8   : > { %758 = shalt.err (!%p755_p5)
}
 0x1b9   : > { %s759_s9 = scalar_lea.hbm %s1013_s24, 128  ;;  %s763_s11 = scalar_lea.hbm %s1059_s5, 256 }
 0x1ba   : > { %p760_p6 = scmp.ne.s32.totalorder %s1013_s24, %s759_s9  ;;  %p764_p10 = scmp.lt.s32.totalorder %s1013_s24, %s1059_s5 }
 0x1bb   : > { %p765_p11 = scmp.lt.s32.totalorder %s763_s11, %s759_s9 }
 0x1bc   : > { %p761_p7 = pnand %p760_p6, %p896_p4 }
 0x1bd   : > { %p766_p12 = por %p765_p11, %p764_p10 }
 0x1be   : > { %p762_p9 = pneg %p761_p7 }
 0x1c0   : > { %p767_p13 = pnand %p766_p12, %p762_p9 }
 0x1c2   : > { %770 = shalt.err (!%p767_p13)
}
 0x1c3   : > { %686 = dma.vmem_to_hbm [thread:$0]  (%p896_p4), %s493_s15, 128, %s1013_s24, %s479_s25  }
 0x1c4 PF: > { %p692_p0 = scmp.ge.s32.totalorder %s821_s23, 2  ;;  %s504_s14 = sand.u32 1, %s801_s18  }
 0x1c5   : > { %s505_s16 = scalar_lea.sflag [#allocation3], %s504_s14 }
 0x1c6   : > { %p689_p1 = pnand %p692_p0, %p903_p8 }
 0x1c8   : > { %p690_p2 = pneg %p689_p1 }
 0x1ca   : > { %796 = dma.done.wait (%p690_p2), %s505_s16, 128  }
 0x1cb   : > { %798 = vsyncadd (%p690_p2), %s505_s16, 4294967168  ;;  %s18_s23 = sadd.s32 1, %s821_s23   ;;  %s1062_s18 = smov %s805_s19 }
 0x1cc   : > { %p15_p3 = scmp.ge.s32.totalorder %s18_s23, 4   ;;  %s1063_s19 = smov %s809_s20 }
 0x1cd   : > { %s1064_s20 = smov %s909_s6  ;;  %s1065_s21 = smov %s817_s22 }
 0x1ce   : > { %s1066_s22 = smov %s1068_s26  ;;  %17 = sbr.rel (!%p15_p3) target bundleno = 4 (0x4), region = 88 }
 0x1d3   :  { %510 = vsyncpa [#allocation3], 1 }
 0x1d4   :  { %512 = vsyncpa [#allocation3 + $0x1], 1 }

</bundles_post_ra>
